<compile_context>
chip_gen: v5e
topology: v5e:2x2
jax: 0.10.0
libtpu: 0.0.40
codegen_flags: <defaults>
</compile_context>

<pallas_src>
import functools

import jax
import jax.numpy as jnp
from jax.experimental import pallas as pl
from jax.experimental.pallas import tpu as pltpu


def _mlp_kernel(xt_ref, w1_ref, w2_ref, w3_ref, w4_ref, o_ref):
    # Batch-on-lanes: every matmul is a plain (M, K) @ (K, bb) with bb on the
    # lane/result axis.  bf16 MXU operands, f32 accumulation, ReLU in f32.
    f32 = jnp.float32
    bf16 = jnp.bfloat16

    h = jnp.dot(w1_ref[...], xt_ref[...], preferred_element_type=f32)   # (64, bb)
    h = jnp.maximum(h, 0.0).astype(bf16)
    h = jnp.dot(w2_ref[...], h, preferred_element_type=f32)             # (64, bb)
    h = jnp.maximum(h, 0.0).astype(bf16)
    h = jnp.dot(w3_ref[...], h, preferred_element_type=f32)             # (8, bb)
    h = jnp.maximum(h, 0.0).astype(bf16)
    out = jnp.dot(w4_ref[...], h, preferred_element_type=f32)           # (1, bb)
    o_ref[...] = out.astype(o_ref.dtype)


def _round_up(n, m):
    return ((n + m - 1) // m) * m


# Above this batch size we always split into >= 2 tiles so both v7x
# TensorCores get work; below it, per-step pipeline overhead dominates and a
# single block is faster.
_SPLIT_THRESHOLD = 2048


@functools.partial(jax.jit, static_argnames=("block_b",))
def mlp_forward(x, w1, w2, w3, w4, *, block_b=8192):
    """x: (B, D) float32.  wK: torch-layout (out_features, in_features) weights.

    Returns (B, 1) float32, matching MLP(x)."""
    B, D = x.shape

    # Single fused transpose+cast copy: lane-dense (D, B) bf16 slab for the
    # kernel.  Weights are tiny; cast them to bf16 too (final layer included).
    xt = x.T.astype(jnp.bfloat16)
    w1b = w1.astype(jnp.bfloat16)       # (64, D)
    w2b = w2.astype(jnp.bfloat16)       # (64, 64)
    w3b = w3.astype(jnp.bfloat16)       # (8, 64)
    w4b = w4.astype(jnp.bfloat16)       # (1, 8)

    # Batch-tile choice: single block for small batches, otherwise >= 2
    # lane-aligned (multiple-of-128) tiles capped at block_b.
    if B <= min(block_b, _SPLIT_THRESHOLD):
        bb = B                                   # block == full dim, any B ok
    else:
        half = _round_up((B + 1) // 2, 128)
        bb = min(block_b, half)
    grid = (pl.cdiv(B, bb),)                     # partial edge block allowed

    out_row = pl.pallas_call(
        _mlp_kernel,
        out_shape=jax.ShapeDtypeStruct((1, B), jnp.float32),
        grid_spec=pltpu.PrefetchScalarGridSpec(
            num_scalar_prefetch=0,
            grid=grid,
            in_specs=[
                pl.BlockSpec((D, bb), lambda i: (0, i)),      # x^T batch tile
                pl.BlockSpec(w1b.shape, lambda i: (0, 0)),    # resident weights
                pl.BlockSpec(w2b.shape, lambda i: (0, 0)),
                pl.BlockSpec(w3b.shape, lambda i: (0, 0)),
                pl.BlockSpec(w4b.shape, lambda i: (0, 0)),
            ],
            out_specs=pl.BlockSpec((1, bb), lambda i: (0, i)),  # lane-dense row
        ),
        compiler_params=pltpu.CompilerParams(
            dimension_semantics=("parallel",),
            vmem_limit_bytes=32 * 1024 * 1024),
    )(xt, w1b, w2b, w3b, w4b)

    # (1, B) lane-dense row -> (B, 1) column.
    return out_row.reshape(B, 1)


def init_mlp_params(key, input_width):
    """Deterministic init mimicking torch's kaiming-uniform (bound=1/sqrt(fan_in)).
    Weights in torch (out_features, in_features) layout."""
    dims = [(64, input_width), (64, 64), (8, 64), (1, 8)]
    keys = jax.random.split(key, len(dims))
    params = []
    for k, (fan_out, fan_in) in zip(keys, dims):
        bound = 1.0 / jnp.sqrt(jnp.float32(fan_in))
        w = jax.random.uniform(k, (fan_out, fan_in), jnp.float32,
                               minval=-bound, maxval=bound)
        params.append(w)
    return params


def mlp_reference_f32(x, w1, w2, w3, w4):
    h = jax.nn.relu(x @ w1.T)
    h = jax.nn.relu(h @ w2.T)
    h = jax.nn.relu(h @ w3.T)
    return h @ w4.T


def mlp_reference_mixed(x, w1, w2, w3, w4):
    """Plain-JAX reference mirroring kernel precision: bf16 operands,
    f32 accumulation, batch-on-lanes orientation, bf16 final layer."""
    bf = jnp.bfloat16
    f32 = jnp.float32
    xt = x.T.astype(bf)
    h = jnp.maximum(jnp.dot(w1.astype(bf), xt, preferred_element_type=f32), 0.0).astype(bf)
    h = jnp.maximum(jnp.dot(w2.astype(bf), h, preferred_element_type=f32), 0.0).astype(bf)
    h = jnp.maximum(jnp.dot(w3.astype(bf), h, preferred_element_type=f32), 0.0).astype(bf)
    out = jnp.dot(w4.astype(bf), h, preferred_element_type=f32)   # (1, B)
    return out.T                                                   # (B, 1)


if __name__ == "__main__":
    key = jax.random.PRNGKey(0)
    k_x1, k_x2, k_x3, k_w = jax.random.split(key, 4)

    input_width = 32
    w1, w2, w3, w4 = init_mlp_params(k_w, input_width)

    def check(out, x, tag):
        ref_m = mlp_reference_mixed(x, w1, w2, w3, w4)
        ref_f = mlp_reference_f32(x, w1, w2, w3, w4)
        assert out.shape == (x.shape[0], 1), (tag, out.shape)
        assert jnp.allclose(out, ref_m, atol=5e-3, rtol=5e-3), \
            f"{tag}: mismatch vs mixed-precision ref"
        assert jnp.allclose(out, ref_f, atol=5e-2, rtol=5e-2), \
            f"{tag}: mismatch vs f32 ref"

    # Case 1: small batch -> single block (grid=(1,)).
    x1 = jax.random.normal(k_x1, (128, input_width), jnp.float32)
    out1 = jax.block_until_ready(mlp_forward(x1, w1, w2, w3, w4))
    check(out1, x1, "single-block")

    # Case 2: tiled path with a partial edge block (B=200, bb=128 -> grid=2).
    x2 = jax.random.normal(k_x2, (200, input_width), jnp.float32)
    out2 = jax.block_until_ready(
        mlp_forward(x2, w1, w2, w3, w4, block_b=128))
    check(out2, x2, "partial-edge-block")

    # Case 3: default block_b, batch above the split threshold -> grid=2.
    x3 = jax.random.normal(k_x3, (2500, input_width), jnp.float32)
    out3 = jax.block_until_ready(mlp_forward(x3, w1, w2, w3, w4))
    check(out3, x3, "split-for-megacore")

    print("KERNEL_OK")
</pallas_src>

<mosaic_0001>
module attributes {stable_mosaic.version = 11 : i64} {
  func.func @_mlp_kernel(%arg0: i32, %arg1: memref<32x128xbf16, #tpu.memory_space<vmem>>, %arg2: memref<64x32xbf16, #tpu.memory_space<vmem>>, %arg3: memref<64x64xbf16, #tpu.memory_space<vmem>>, %arg4: memref<8x64xbf16, #tpu.memory_space<vmem>>, %arg5: memref<1x8xbf16, #tpu.memory_space<vmem>>, %arg6: memref<1x128xf32, #tpu.memory_space<vmem>>) attributes {dimension_semantics = [#tpu.dimension_semantics<parallel>], iteration_bounds = array<i64: 1>, scalar_prefetch = 0 : i64, scratch_operands = 0 : i64, tpu.core_type = #tpu.core_type<tc>, window_params = [{transform_indices = @transform_0, window_bounds = array<i64: 32, 128>}, {pipeline_mode = #tpu.pipeline_mode<synchronous>, transform_indices = @transform_1, window_bounds = array<i64: 64, 32>}, {pipeline_mode = #tpu.pipeline_mode<synchronous>, transform_indices = @transform_2, window_bounds = array<i64: 64, 64>}, {pipeline_mode = #tpu.pipeline_mode<synchronous>, transform_indices = @transform_3, window_bounds = array<i64: 8, 64>}, {pipeline_mode = #tpu.pipeline_mode<synchronous>, transform_indices = @transform_4, window_bounds = array<i64: 1, 8>}, {transform_indices = @transform_5, window_bounds = array<i64: 1, 128>}]} {
    %c0 = arith.constant 0 : index
    %c0_0 = arith.constant 0 : index
    %0 = vector.load %arg2[%c0, %c0_0] : memref<64x32xbf16, #tpu.memory_space<vmem>>, vector<64x32xbf16>
    %c0_1 = arith.constant 0 : index
    %c0_2 = arith.constant 0 : index
    %1 = vector.load %arg1[%c0_1, %c0_2] : memref<32x128xbf16, #tpu.memory_space<vmem>>, vector<32x128xbf16>
    %cst = arith.constant dense<0.000000e+00> : vector<64x128xf32>
    %2 = tpu.matmul %0, %1, %cst {dimension_numbers = #tpu.dot_dimension_numbers<[1], [0], [0], [1], [0, 0, 1, 1], [], []>} : vector<64x32xbf16>, vector<32x128xbf16>, vector<64x128xf32> -> vector<64x128xf32>
    %cst_3 = arith.constant 0.000000e+00 : f32
    %3 = vector.broadcast %cst_3 : f32 to vector<64x128xf32>
    %4 = arith.maximumf %2, %3 : vector<64x128xf32>
    %5 = arith.truncf %4 : vector<64x128xf32> to vector<64x128xbf16>
    %c0_4 = arith.constant 0 : index
    %c0_5 = arith.constant 0 : index
    %6 = vector.load %arg3[%c0_4, %c0_5] : memref<64x64xbf16, #tpu.memory_space<vmem>>, vector<64x64xbf16>
    %cst_6 = arith.constant dense<0.000000e+00> : vector<64x128xf32>
    %7 = tpu.matmul %6, %5, %cst_6 {dimension_numbers = #tpu.dot_dimension_numbers<[1], [0], [0], [1], [0, 0, 1, 1], [], []>} : vector<64x64xbf16>, vector<64x128xbf16>, vector<64x128xf32> -> vector<64x128xf32>
    %cst_7 = arith.constant 0.000000e+00 : f32
    %8 = vector.broadcast %cst_7 : f32 to vector<64x128xf32>
    %9 = arith.maximumf %7, %8 : vector<64x128xf32>
    %10 = arith.truncf %9 : vector<64x128xf32> to vector<64x128xbf16>
    %c0_8 = arith.constant 0 : index
    %c0_9 = arith.constant 0 : index
    %11 = vector.load %arg4[%c0_8, %c0_9] : memref<8x64xbf16, #tpu.memory_space<vmem>>, vector<8x64xbf16>
    %cst_10 = arith.constant dense<0.000000e+00> : vector<8x128xf32>
    %12 = tpu.matmul %11, %10, %cst_10 {dimension_numbers = #tpu.dot_dimension_numbers<[1], [0], [0], [1], [0, 0, 1, 1], [], []>} : vector<8x64xbf16>, vector<64x128xbf16>, vector<8x128xf32> -> vector<8x128xf32>
    %cst_11 = arith.constant 0.000000e+00 : f32
    %13 = vector.broadcast %cst_11 : f32 to vector<8x128xf32>
    %14 = arith.maximumf %12, %13 : vector<8x128xf32>
    %15 = arith.truncf %14 : vector<8x128xf32> to vector<8x128xbf16>
    %c0_12 = arith.constant 0 : index
    %c0_13 = arith.constant 0 : index
    %16 = vector.load %arg5[%c0_12, %c0_13] : memref<1x8xbf16, #tpu.memory_space<vmem>>, vector<1x8xbf16>
    %cst_14 = arith.constant dense<0.000000e+00> : vector<1x128xf32>
    %17 = tpu.matmul %16, %15, %cst_14 {dimension_numbers = #tpu.dot_dimension_numbers<[1], [0], [0], [1], [0, 0, 1, 1], [], []>} : vector<1x8xbf16>, vector<8x128xbf16>, vector<1x128xf32> -> vector<1x128xf32>
    %c0_15 = arith.constant 0 : index
    %c0_16 = arith.constant 0 : index
    %18 = vector.load %arg6[%c0_15, %c0_16] : memref<1x128xf32, #tpu.memory_space<vmem>>, vector<1x128xf32>
    tpu.vector_store %arg6[%c0_15, %c0_16], %17 {strides = array<i32>} : memref<1x128xf32, #tpu.memory_space<vmem>>, vector<1x128xf32>,
    return
  }
  func.func @transform_0(%arg0: i32) -> (i32, i32) {
    %c0_i32 = arith.constant 0 : i32
    %c0_i32_0 = arith.constant 0 : i32
    return %c0_i32, %arg0 : i32, i32
  }
  func.func @transform_1(%arg0: i32) -> (i32, i32) {
    %c0_i32 = arith.constant 0 : i32
    %c0_i32_0 = arith.constant 0 : i32
    %c0_i32_1 = arith.constant 0 : i32
    return %c0_i32, %c0_i32_0 : i32, i32
  }
  func.func @transform_2(%arg0: i32) -> (i32, i32) {
    %c0_i32 = arith.constant 0 : i32
    %c0_i32_0 = arith.constant 0 : i32
    %c0_i32_1 = arith.constant 0 : i32
    return %c0_i32, %c0_i32_0 : i32, i32
  }
  func.func @transform_3(%arg0: i32) -> (i32, i32) {
    %c0_i32 = arith.constant 0 : i32
    %c0_i32_0 = arith.constant 0 : i32
    %c0_i32_1 = arith.constant 0 : i32
    return %c0_i32, %c0_i32_0 : i32, i32
  }
  func.func @transform_4(%arg0: i32) -> (i32, i32) {
    %c0_i32 = arith.constant 0 : i32
    %c0_i32_0 = arith.constant 0 : i32
    %c0_i32_1 = arith.constant 0 : i32
    return %c0_i32, %c0_i32_0 : i32, i32
  }
  func.func @transform_5(%arg0: i32) -> (i32, i32) {
    %c0_i32 = arith.constant 0 : i32
    %c0_i32_0 = arith.constant 0 : i32
    return %c0_i32, %arg0 : i32, i32
  }
}

</mosaic_0001>

<bundles_post_ra>
// kernel: mlp_forward.1
= control target key start
LH: loop header
LB: loop body
LE: loop exit
PB: predicated region body
PF: predicated region fallthrough
CT: control target
= control target key end

     0   :  { %s428_s0 = inlined_call_operand.vmem [shape: bf16[32,128], index: 0, kind: input, shape index: {}]   ;;  %s429_s1 = inlined_call_operand.vmem [shape: bf16[64,32], index: 1, kind: input, shape index: {}]   ;;  %s430_s2 = inlined_call_operand.vmem [shape: bf16[64,64], index: 2, kind: input, shape index: {}]   ;;  %s431_s3 = inlined_call_operand.vmem [shape: bf16[8,64], index: 3, kind: input, shape index: {}]   ;;  %s432_s4 = inlined_call_operand.vmem [shape: bf16[1,8], index: 4, kind: input, shape index: {}]   ;;  %s433_s5 = inlined_call_operand.hbm [shape: f32[1,128], index: 5, kind: output, shape index: {}]  }
   0x1   :  { %v315_v0 = vld [vmem:[%s428_s0 + $0x8] sm:$0xff]  ;;  %v314_v1 = vld [vmem:[%s428_s0] sm:$0xff] }
   0x2   :  { %85 = vmatpush.bf16.msra.mxu0 %v315_v0  ;;  %320 = vmatpush.bf16.msra.mxu2 %v315_v0 }
   0x3   :  { %10 = vsyncpa [#allocation3], 0  ;;  %v310_v2 = vld [vmem:[%s429_s1] sm:$0xff]  ;;  %v313_v3 = vld [vmem:[%s429_s1 + $0x18] sm:$0xff]  ;;  %vm66_vm0 = vcmask 261120   ;;  %vm148_vm1 = vcmask 523264  }
   0x4   :  { %v311_v4 = vld [vmem:[%s429_s1 + $0x8] sm:$0xff]  ;;  %v312_v5 = vld [vmem:[%s429_s1 + $0x10] sm:$0xff]  ;;  %v316_v26 = vld [vmem:[%s430_s2] sm:$0xff]  ;;  %vm226_vm2 = vcmask 1043456   ;;  %vm222_vm3 = vcmask 64512   ;;  %s353_s14 = smov [#allocation2]  }
   0x5   :  { %v319_v27 = vld [vmem:[%s430_s2 + $0x18] sm:$0xff]  ;;  %v317_v28 = vld [vmem:[%s430_s2 + $0x8] sm:$0xff]  ;;  %v318_v29 = vld [vmem:[%s430_s2 + $0x10] sm:$0xff]  ;;  %s249_s15 = sshll.u32 %s353_s14, 4  ;;  %s250_s15 = int_to_ptr.vmem [resolvable:$true] %s249_s15 }
   0x6   :  { %86 = vmatpush.bf16.msra.mxu0 %v314_v1  ;;  %321 = vmatpush.bf16.msra.mxu2 %v314_v1  ;;  %v202_v50 = vld [vmem:[%s431_s3] sm:$0xf]  ;;  %s251_s3 = sshll.u32 %s433_s5, 4  ;;  %s252_s3 = int_to_ptr.hbm [resolvable:$true] %s251_s3 }
   0x7   :  { %v221_v55 = vld [vmem:[%s432_s4] sm:$0x1] }
   0x9   :  { %284 = vmatmul.msk.bf16.vlgmr.msra.gmra.mxu0 %vm66_vm0, %v310_v2  ;;  %287 = vmatmul.msk.bf16.vlgmr.msra.gmra.mxu2 %vm66_vm0, %v313_v3 }
  0x19   :  { %285 = vmatmul.msk.bf16.gmra.mxu0 %vm66_vm0, %v311_v4 }
  0x29   :  { %286 = vmatmul.msk.bf16.gmra.mxu0 %vm66_vm0, %v312_v5 }
  0x86   :  { %v88_v6 = vpop.f32.mrf.mxu0 }
  0x87   :  { %v108_v24 = vmax.f32 %v88_v6, 0.0 }
  0x8c   :  { %v103_v7 = vpop.f32.mrf.mxu2 }
  0x8d   :  { %v114_v9 = vmax.f32 %v103_v7, 0.0 }
  0x8e   :  { %v90_v8 = vpop.f32.mrf.mxu0 }
  0x8f   :  { %v109_v22 = vmax.f32 %v90_v8, 0.0 }
  0x91   :  { %v116_v25 = vpack.c.bf16 %v109_v22, %v108_v24 }
  0x94   :  { %v105_v10 = vpop.f32.mrf.mxu2 }
  0x95   :  { %v115_v11 = vmax.f32 %v105_v10, 0.0 }
  0x96   :  { %v93_v12 = vpop.f32.mrf.mxu0 }
  0x97   :  { %v119_v13 = vpack.c.bf16 %v115_v11, %v114_v9  ;;  %v110_v21 = vmax.f32 %v93_v12, 0.0 }
  0x99   :  { %165 = vmatpush.bf16.msra.mxu1 %v119_v13  ;;  %322 = vmatpush.bf16.msra.mxu3 %v119_v13 }
  0x9e   :  { %v95_v14 = vpop.f32.mrf.mxu0 }
  0x9f   :  { %v111_v19 = vmax.f32 %v95_v14, 0.0 }
  0xa1   :  { %v117_v23 = vpack.c.bf16 %v111_v19, %v110_v21 }
  0xa6   :  { %v98_v15 = vpop.f32.mrf.mxu0 }
  0xa7   :  { %v112_v17 = vmax.f32 %v98_v15, 0.0 }
  0xae   :  { %v100_v16 = vpop.f32.mrf.mxu0 }
  0xaf   :  { %v113_v18 = vmax.f32 %v100_v16, 0.0 }
  0xb1   :  { %v118_v20 = vpack.c.bf16 %v113_v18, %v112_v17 }
  0xb3   :  { %166 = vmatpush.bf16.msra.mxu1 %v118_v20  ;;  %323 = vmatpush.bf16.msra.mxu3 %v118_v20 }
  0xb7   :  { %167 = vmatpush.bf16.msra.mxu1 %v117_v23  ;;  %324 = vmatpush.bf16.msra.mxu3 %v117_v23 }
  0xbb   :  { %168 = vmatpush.bf16.msra.mxu1 %v116_v25  ;;  %325 = vmatpush.bf16.msra.mxu3 %v116_v25 }
  0xbe   :  { %304 = vmatmul.msk.bf16.vlgmr.msra.gmra.mxu1 %vm148_vm1, %v316_v26  ;;  %307 = vmatmul.msk.bf16.vlgmr.msra.gmra.mxu3 %vm148_vm1, %v319_v27 }
  0xce   :  { %305 = vmatmul.msk.bf16.gmra.mxu1 %vm148_vm1, %v317_v28 }
  0xde   :  { %306 = vmatmul.msk.bf16.gmra.mxu1 %vm148_vm1, %v318_v29 }
 0x13b   :  { %v170_v30 = vpop.f32.mrf.mxu1 }
 0x13c   :  { %v190_v48 = vmax.f32 %v170_v30, 0.0 }
 0x141   :  { %v185_v31 = vpop.f32.mrf.mxu3 }
 0x142   :  { %v196_v33 = vmax.f32 %v185_v31, 0.0 }
 0x143   :  { %v172_v32 = vpop.f32.mrf.mxu1 }
 0x144   :  { %v191_v46 = vmax.f32 %v172_v32, 0.0 }
 0x146   :  { %v198_v49 = vpack.c.bf16 %v191_v46, %v190_v48 }
 0x149   :  { %v187_v34 = vpop.f32.mrf.mxu3 }
 0x14a   :  { %v197_v35 = vmax.f32 %v187_v34, 0.0 }
 0x14b   :  { %v175_v36 = vpop.f32.mrf.mxu1 }
 0x14c   :  { %v201_v37 = vpack.c.bf16 %v197_v35, %v196_v33  ;;  %v192_v45 = vmax.f32 %v175_v36, 0.0 }
 0x14e   :  { %210 = vmatpush.bf16.msrb.mxu2 %v201_v37 }
 0x153   :  { %v177_v38 = vpop.f32.mrf.mxu1 }
 0x154   :  { %v193_v43 = vmax.f32 %v177_v38, 0.0 }
 0x156   :  { %v199_v47 = vpack.c.bf16 %v193_v43, %v192_v45 }
 0x15b   :  { %v180_v39 = vpop.f32.mrf.mxu1 }
 0x15c   :  { %v194_v41 = vmax.f32 %v180_v39, 0.0 }
 0x163   :  { %v182_v40 = vpop.f32.mrf.mxu1 }
 0x164   :  { %v195_v42 = vmax.f32 %v182_v40, 0.0 }
 0x166   :  { %v200_v44 = vpack.c.bf16 %v195_v42, %v194_v41 }
 0x168   :  { %211 = vmatpush.bf16.msrb.mxu2 %v200_v44 }
 0x16c   :  { %212 = vmatpush.bf16.msrb.mxu2 %v199_v47 }
 0x170   :  { %213 = vmatpush.bf16.msrb.mxu2 %v198_v49 }
 0x173   :  { %308 = vmatmul.msk.bf16.vlgmr.msrb.gmra.mxu2 %vm148_vm1, %v202_v50 }
 0x1f6   :  { %v215_v51 = vpop.f32.mrf.mxu2 }
 0x1f7   :  { %v219_v52 = vmax.f32 %v215_v51, 0.0 }
 0x1f9   :  { %v220_v53 = vpack.c.bf16 %v219_v52, %v219_v52 }
 0x1fb   :  { %v228_v54 = vsel %vm226_vm2, %v220_v53, 0 }
 0x1fc   :  { %237 = vmatpush.bf16.msrb.mxu3 %v228_v54 }
 0x1fe   :  { %v217_v56 = vpop.f32.mrf.mxu2 }
 0x1ff   :  { %309 = vmatmul.msk.bf16.vlgmr.msrb.gmra.mxu3 %vm222_vm3, %v221_v55 }
 0x282   :  { %v239_v57 = vpop.f32.mrf.mxu3 }
 0x283   :  { %243 = vst [vmem:[#allocation2] sm:$0x1] %v239_v57 }
 0x284   :  { %254 = dma.vmem_to_hbm [thread:$0]  %s250_s15, 16, %s252_s3, [#allocation3]  }
 0x28a   :  { %v241_v58 = vpop.f32.mrf.mxu3 }
 0x28b   :  { %351 = dma.done.wait [#allocation3], 16  }
 0x28c   :  { %352 = vsyncadd [#allocation3], 4294967280 }
 0x28d   :  { %259 = vsyncpa [#allocation3], 1 }

</bundles_post_ra>
